<compile_context>
chip_gen: v5e
topology: v5e:2x2
jax: 0.10.0
libtpu: 0.0.40
codegen_flags: <defaults>
</compile_context>

<pallas_src>
import functools

import jax
import jax.numpy as jnp
from jax.experimental import pallas as pl
from jax.experimental.pallas import tpu as pltpu


def qlinear_kernel(x_ref, wt_ref, scales_ref, bias_ref, o_ref, acc_ref, *,
                   compute_dtype):
    """One (tb, tn) output tile; accumulates over the K grid axis."""
    k = pl.program_id(2)

    @pl.when(k == 0)
    def _():
        acc_ref[...] = jnp.zeros_like(acc_ref)

    x = x_ref[...].astype(compute_dtype)           # (tb, tk) activations
    w = wt_ref[...].astype(compute_dtype)          # (tk, tn) int8 -> bf16 (exact)
    acc_ref[...] += jnp.dot(x, w, preferred_element_type=jnp.float32)

    @pl.when(k == pl.num_programs(2) - 1)
    def _():
        # Per-output-channel scale + bias, float32 throughout, then cast out.
        out = acc_ref[...] * scales_ref[...] + bias_ref[...]
        o_ref[...] = out.astype(o_ref.dtype)


def _round_up(v, m):
    return ((v + m - 1) // m) * m


@functools.partial(jax.jit,
                   static_argnames=("tb_max", "tn_max", "tk_max", "compute_dtype"))
def quantized_linear(x, qweights, scales, bias=None, *,
                     tb_max=128, tn_max=256, tk_max=512,
                     compute_dtype=jnp.bfloat16):
    """x: (B, K) float; qweights: (N, K) int8; scales, bias: (N,) float.

    Returns (B, N) in x.dtype. The matmul runs in `compute_dtype` (bf16 by default)
    with float32 accumulation; the int8->bf16 weight cast is exact, the activation
    cast introduces ~1e-3 relative error vs a pure-f32 reference.
    """
    B, K = x.shape
    N, K2 = qweights.shape
    assert K == K2, "qweights must be (out_features, in_features)"

    # Tile sizes: big enough to keep the MXU busy, aligned to (8, 128).
    tb = min(tb_max, _round_up(B, 8))
    tn = min(tn_max, _round_up(N, 128))
    tk = min(tk_max, _round_up(K, 128))

    Bp, Np, Kp = _round_up(B, tb), _round_up(N, tn), _round_up(K, tk)

    # Pad ragged shapes with zeros; padded rows/cols are sliced off below.
    x_p = x if (Bp == B and Kp == K) else jnp.pad(x, ((0, Bp - B), (0, Kp - K)))
    # Pre-transpose the int8 weight to (K, N) once so the kernel needs no transpose.
    # TODO(synk): in a real deployment store the quantized weight as (K, N) at
    # quantize time instead of transposing per call.
    w_t = qweights.T
    w_p = w_t if (Kp == K and Np == N) else jnp.pad(w_t, ((0, Kp - K), (0, Np - N)))

    if bias is None:
        bias = jnp.zeros((N,), jnp.float32)
    s_p = jnp.pad(scales.astype(jnp.float32), (0, Np - N)).reshape(1, Np)
    b_p = jnp.pad(bias.astype(jnp.float32), (0, Np - N)).reshape(1, Np)

    grid = (Bp // tb, Np // tn, Kp // tk)

    out = pl.pallas_call(
        functools.partial(qlinear_kernel, compute_dtype=compute_dtype),
        out_shape=jax.ShapeDtypeStruct((Bp, Np), x.dtype),
        grid_spec=pltpu.PrefetchScalarGridSpec(
            num_scalar_prefetch=0,
            grid=grid,
            in_specs=[
                pl.BlockSpec((tb, tk), lambda i, j, k: (i, k)),   # x tile
                pl.BlockSpec((tk, tn), lambda i, j, k: (k, j)),   # int8 weight tile (K,N)
                pl.BlockSpec((1, tn), lambda i, j, k: (0, j)),    # scales (f32)
                pl.BlockSpec((1, tn), lambda i, j, k: (0, j)),    # bias (f32)
            ],
            out_specs=pl.BlockSpec((tb, tn), lambda i, j, k: (i, j)),
            scratch_shapes=[pltpu.VMEM((tb, tn), jnp.float32)],   # f32 accumulator
        ),
        compiler_params=pltpu.CompilerParams(
            dimension_semantics=("parallel", "parallel", "arbitrary")),
    )(x_p, w_p, s_p, b_p)

    return out[:B, :N]


def quantize_per_channel(weights):
    """Mirror of QuantizedLinearLayer.quantize_per_channel (plain-JAX glue)."""
    max_vals = jnp.max(jnp.abs(weights), axis=1, keepdims=True)     # (N, 1)
    # Guard all-zero channels (scale=0 would give NaN/inf quantized weights).
    scales = jnp.maximum(max_vals, jnp.finfo(weights.dtype).tiny) / 127.0
    q = jnp.clip(jnp.round(weights / scales), -128, 127).astype(jnp.int8)
    return q, scales.reshape(-1)


if __name__ == "__main__":
    # Small, deterministic setup; deliberately ragged (20, 192, 96) + tk_max=128
    # to exercise padding and the K-reduction accumulation path.
    batch, in_features, out_features = 20, 192, 96
    key = jax.random.PRNGKey(0)
    k_x, k_w, k_b = jax.random.split(key, 3)

    x = jax.random.normal(k_x, (batch, in_features), dtype=jnp.float32)
    w_fp = jax.random.normal(k_w, (out_features, in_features), dtype=jnp.float32)
    bias = jax.random.normal(k_b, (out_features,), dtype=jnp.float32)

    qweights, scales = quantize_per_channel(w_fp)

    out = quantized_linear(x, qweights, scales, bias, tk_max=128)
    out = jax.block_until_ready(out)

    # Pure-JAX f32 reference of the PyTorch forward. The kernel casts activations
    # to bf16 (the int8->bf16 weight cast is exact), so tolerance is relaxed to
    # cover the activation-cast rounding (quantization error itself is identical
    # on both sides since both use the same int8 weights).
    ref = (x @ qweights.astype(jnp.float32).T) * scales.reshape(1, -1) + bias.reshape(1, -1)
    assert out.shape == (batch, out_features)
    assert jnp.allclose(out, ref, atol=0.3, rtol=3e-2), "mismatch vs reference"

    print("KERNEL_OK")
</pallas_src>

<mosaic_0001>
module attributes {stable_mosaic.version = 11 : i64} {
  func.func @qlinear_kernel(%arg0: i32, %arg1: i32, %arg2: i32, %arg3: memref<24x128xf32, #tpu.memory_space<vmem>>, %arg4: memref<128x128xi8, #tpu.memory_space<vmem>>, %arg5: memref<1x128xf32, #tpu.memory_space<vmem>>, %arg6: memref<1x128xf32, #tpu.memory_space<vmem>>, %arg7: memref<24x128xf32, #tpu.memory_space<vmem>>, %arg8: memref<24x128xf32, #tpu.memory_space<vmem>>) attributes {dimension_semantics = [#tpu.dimension_semantics<parallel>, #tpu.dimension_semantics<parallel>, #tpu.dimension_semantics<arbitrary>], iteration_bounds = array<i64: 1, 1, 2>, scalar_prefetch = 0 : i64, scratch_operands = 1 : i64, tpu.core_type = #tpu.core_type<tc>, window_params = [{transform_indices = @transform_0, window_bounds = array<i64: 24, 128>}, {transform_indices = @transform_1, window_bounds = array<i64: 128, 128>}, {transform_indices = @transform_2, window_bounds = array<i64: 1, 128>}, {transform_indices = @transform_3, window_bounds = array<i64: 1, 128>}, {transform_indices = @transform_4, window_bounds = array<i64: 24, 128>}]} {
    %c0_i32 = arith.constant 0 : i32
    %0 = arith.cmpi eq, %arg2, %c0_i32 : i32
    %1 = arith.extui %0 : i1 to i32
    %c0_i32_0 = arith.constant 0 : i32
    %2 = arith.cmpi ne, %1, %c0_i32_0 : i32
    scf.if %2 {
      %cst_9 = arith.constant 0.000000e+00 : f32
      %14 = vector.broadcast %cst_9 : f32 to vector<24x128xf32>
      %c0_10 = arith.constant 0 : index
      %c0_11 = arith.constant 0 : index
      %15 = vector.load %arg8[%c0_10, %c0_11] : memref<24x128xf32, #tpu.memory_space<vmem>>, vector<24x128xf32>
      tpu.vector_store %arg8[%c0_10, %c0_11], %14 {strides = array<i32>} : memref<24x128xf32, #tpu.memory_space<vmem>>, vector<24x128xf32>,
    } else {
    }
    %c0 = arith.constant 0 : index
    %c0_1 = arith.constant 0 : index
    %3 = vector.load %arg3[%c0, %c0_1] : memref<24x128xf32, #tpu.memory_space<vmem>>, vector<24x128xf32>
    %4 = arith.truncf %3 : vector<24x128xf32> to vector<24x128xbf16>
    %c0_2 = arith.constant 0 : index
    %c0_3 = arith.constant 0 : index
    %5 = vector.load %arg4[%c0_2, %c0_3] : memref<128x128xi8, #tpu.memory_space<vmem>>, vector<128x128xi8>
    %6 = arith.sitofp %5 : vector<128x128xi8> to vector<128x128xbf16>
    %c0_4 = arith.constant 0 : index
    %c0_5 = arith.constant 0 : index
    %7 = vector.load %arg8[%c0_4, %c0_5] : memref<24x128xf32, #tpu.memory_space<vmem>>, vector<24x128xf32>
    %cst = arith.constant dense<0.000000e+00> : vector<24x128xf32>
    %8 = tpu.matmul %4, %6, %cst {dimension_numbers = #tpu.dot_dimension_numbers<[1], [0], [0], [1], [0, 0, 1, 1], [], []>} : vector<24x128xbf16>, vector<128x128xbf16>, vector<24x128xf32> -> vector<24x128xf32>
    %9 = arith.addf %7, %8 : vector<24x128xf32>
    %c0_6 = arith.constant 0 : index
    %c0_7 = arith.constant 0 : index
    %10 = vector.load %arg8[%c0_6, %c0_7] : memref<24x128xf32, #tpu.memory_space<vmem>>, vector<24x128xf32>
    tpu.vector_store %arg8[%c0_6, %c0_7], %9 {strides = array<i32>} : memref<24x128xf32, #tpu.memory_space<vmem>>, vector<24x128xf32>,
    %c1_i32 = arith.constant 1 : i32
    %11 = arith.cmpi eq, %arg2, %c1_i32 : i32
    %12 = arith.extui %11 : i1 to i32
    %c0_i32_8 = arith.constant 0 : i32
    %13 = arith.cmpi ne, %12, %c0_i32_8 : i32
    scf.if %13 {
      %c0_9 = arith.constant 0 : index
      %c0_10 = arith.constant 0 : index
      %14 = vector.load %arg8[%c0_9, %c0_10] : memref<24x128xf32, #tpu.memory_space<vmem>>, vector<24x128xf32>
      %c0_11 = arith.constant 0 : index
      %c0_12 = arith.constant 0 : index
      %15 = vector.load %arg5[%c0_11, %c0_12] : memref<1x128xf32, #tpu.memory_space<vmem>>, vector<1x128xf32>
      %16 = vector.broadcast %15 : vector<1x128xf32> to vector<24x128xf32>
      %17 = arith.mulf %14, %16 : vector<24x128xf32>
      %c0_13 = arith.constant 0 : index
      %c0_14 = arith.constant 0 : index
      %18 = vector.load %arg6[%c0_13, %c0_14] : memref<1x128xf32, #tpu.memory_space<vmem>>, vector<1x128xf32>
      %19 = vector.broadcast %18 : vector<1x128xf32> to vector<24x128xf32>
      %20 = arith.addf %17, %19 : vector<24x128xf32>
      %c0_15 = arith.constant 0 : index
      %c0_16 = arith.constant 0 : index
      %21 = vector.load %arg7[%c0_15, %c0_16] : memref<24x128xf32, #tpu.memory_space<vmem>>, vector<24x128xf32>
      tpu.vector_store %arg7[%c0_15, %c0_16], %20 {strides = array<i32>} : memref<24x128xf32, #tpu.memory_space<vmem>>, vector<24x128xf32>,
    } else {
    }
    return
  }
  func.func @transform_0(%arg0: i32, %arg1: i32, %arg2: i32) -> (i32, i32) {
    %c0_i32 = arith.constant 0 : i32
    return %arg0, %arg2 : i32, i32
  }
  func.func @transform_1(%arg0: i32, %arg1: i32, %arg2: i32) -> (i32, i32) {
    %c0_i32 = arith.constant 0 : i32
    return %arg2, %arg1 : i32, i32
  }
  func.func @transform_2(%arg0: i32, %arg1: i32, %arg2: i32) -> (i32, i32) {
    %c0_i32 = arith.constant 0 : i32
    %c0_i32_0 = arith.constant 0 : i32
    return %c0_i32, %arg1 : i32, i32
  }
  func.func @transform_3(%arg0: i32, %arg1: i32, %arg2: i32) -> (i32, i32) {
    %c0_i32 = arith.constant 0 : i32
    %c0_i32_0 = arith.constant 0 : i32
    return %c0_i32, %arg1 : i32, i32
  }
  func.func @transform_4(%arg0: i32, %arg1: i32, %arg2: i32) -> (i32, i32) {
    %c0_i32 = arith.constant 0 : i32
    return %arg0, %arg1 : i32, i32
  }
}

</mosaic_0001>

<bundles_post_ra>
// kernel: quantized_linear.1
= control target key start
LH: loop header
LB: loop body
LE: loop exit
PB: predicated region body
PF: predicated region fallthrough
CT: control target
= control target key end

     0   :  { %9 = vsyncpa [#allocation5], 0  ;;  %s723_s15 = smov 0   ;;  %s725_s16 = smov 0   ;;  %s813_s0 = inlined_call_operand.vmem [shape: f32[24,256], index: 0, kind: input, shape index: {}]   ;;  %s814_s1 = inlined_call_operand.vmem [shape: s8[256,128], index: 1, kind: input, shape index: {}]   ;;  %s815_s2 = inlined_call_operand.vmem [shape: f32[1,128], index: 2, kind: input, shape index: {}]   ;;  %s816_s3 = inlined_call_operand.vmem [shape: f32[1,128], index: 3, kind: input, shape index: {}]   ;;  %s817_s4 = inlined_call_operand.hbm [shape: f32[24,128], index: 4, kind: output, shape index: {}]  }
   0x1   :  { %s727_s17 = smov 0   ;;  %s729_s18 = smov 0  }
   0x2   :  { %s731_s19 = smov 0  }
   0x3 LB: > { %s545_s20 = sadd.s32 4294967295, %s692_s19   ;;  %s27_s21 = sadd.s32 1, %s688_s18  ;;  %s692_s19 = sphi %s731_s19, %s15_s19   ;;  %s688_s18 = sphi %s729_s18, %s821_s18   ;;  %s684_s17 = sphi %s727_s17, %s820_s17   ;;  %s680_s16 = sphi %s725_s16, %s819_s16   ;;  %s676_s15 = sphi %s723_s15, %s818_s15  }
   0x4   : > { %p28_p0 = scmp.ge.s32.totalorder %s27_s21, 2  ;;  %p50_p1 = scmp.ne.s32.totalorder %s680_s16, %s676_s15 }
   0x5   : > { %p51_p2 = scmp.eq.s32.totalorder %s692_s19, 0  ;;  %s43_s23 = sadd.s32 1, %s680_s16 }
   0x6   : > { %s823_s21 = smov (%p28_p0, %s27_s21), 0  ;;  %p549_p5 = scmp.ge.s32.totalorder %s692_s19, 2 }
   0x7   : > { %p52_p3 = por %p51_p2, %p50_p1  ;;  %s39_s22 = ssub.s32 %s688_s18, %s823_s21 }
   0x8   : > { %p41_p4 = scmp.eq.s32.totalorder %s39_s22, 0  ;;  %196 = sbr.rel (%p549_p5) target bundleno = 20 (0x14), region = 24 }
   0xa   : > { %s759_s24 = scalar_select %p41_p4, %s680_s16, %s43_s23  }
   0xd   : > { %199 = sbr.rel (!%p52_p3) target bundleno = 20 (0x14), region = 28  ;;  %s201_s25 = sand.u32 (%p52_p3), 1, %s680_s16  }
   0xe   : > { %s550_s26 = sshll.u32 (%p52_p3), %s688_s18, 3  ;;  %s568_s27 = smul.u32 (%p52_p3), 24, %s201_s25 }
   0xf   : > { %s208_s30 = scalar_lea.vmem (%p52_p3), %s813_s0, %s550_s26 }
  0x10   : > { %v241_v0 = vld [vmem:[%s208_s30] sm:$0xff] (%p52_p3)  ;;  %v243_v1 = vld [vmem:[%s208_s30 + $0x10] sm:$0xff] (%p52_p3)  ;;  %s203_s5 = scalar_lea.vmem (%p52_p3), [#allocation3], %s568_s27 }
  0x11   : > { %v245_v2 = vld [vmem:[%s208_s30 + $0x20] sm:$0xff] (%p52_p3)  ;;  %242 = vst [vmem:[%s203_s5] sm:$0xff] (%p52_p3), %v241_v0 }
  0x12   : > { %244 = vst [vmem:[%s203_s5 + $0x8] sm:$0xff] %v243_v1 }
  0x13   : > { %246 = vst [vmem:[%s203_s5 + $0x10] sm:$0xff] %v245_v2 }
  0x14 PF: > { %p551_p6 = scmp.ge.s32.totalorder %s692_s19, 1  ;;  %p263_p7 = scmp.lt.s32.totalorder %s692_s19, 3 }
  0x16   : > { %p264_p8 = pnand %p551_p6, %p263_p7 }
  0x17   : > { %s270_s6 = sand.u32 (!%p264_p8), 1, %s676_s15   ;;  %s552_s7 = sshll.u32 (!%p264_p8), %s684_s17, 2 }
  0x18   : > { %267 = sbr.rel (%p264_p8) target bundleno = 231 (0xe7), region = 70  ;;  %p306_p9 = scmp.lt.s32.totalorder (!%p264_p8), %s552_s7, 7 }
  0x19   : > { %s569_s8 = smul.u32 (!%p264_p8), 24, %s270_s6  ;;  %p554_p10 = scmp.ne.s32.totalorder (!%p264_p8), %s684_s17, 0 }
  0x1b   : > { %s776_s13 = scalar_lea.vmem (!%p264_p8), [#allocation3], %s569_s8 }
  0x1d   : > { %s825_s7 = smov (!%p306_p9, %s552_s7), 7  ;;  %324 = sbr.rel (%p554_p10) target bundleno = 38 (0x26), region = 78 }
  0x1e   : > { %s553_s9 = sshll.u32 %s825_s7, 3 }
  0x1f   : > { %s774_s12 = scalar_lea.vmem %s814_s1, %s553_s9 }
  0x22   : > { %v694_v3 = vmov 0.0  }
  0x23   : > { %325 = vst [vmem:[#allocation2 + $0x10] sm:$0xff] %v694_v3 }
  0x24   : > { %326 = vst [vmem:[#allocation2] sm:$0xff] %v694_v3 }
  0x25   : > { %327 = vst [vmem:[#allocation2 + $0x8] sm:$0xff] %v694_v3 }
  0x26 PF: > { %v336_v4 = vld [vmem:[%s774_s12 + $0x18] sm:$0xff]  ;;  %v335_v5 = vld [vmem:[%s774_s12 + $0x10] sm:$0xff]  ;;  %v334_v22 = vld [vmem:[%s774_s12 + $0x8] sm:$0xff]  ;;  %p555_p11 = scmp.ne.s32.totalorder %s684_s17, 1 }
  0x27   : > { %v351_v6 = vunpack.c.2.s8 %v336_v4  ;;  %v352_v7 = vunpack.c.3.s8 %v336_v4  ;;  %v349_v8 = vunpack.c.0.s8 %v336_v4  ;;  %v350_v9 = vunpack.c.1.s8 %v336_v4  ;;  %v333_v33 = vld [vmem:[%s774_s12] sm:$0xff]  ;;  %v328_v48 = vld [vmem:[%s776_s13] sm:$0xff] }
  0x28   : > { %v347_v10 = vunpack.c.2.s8 %v335_v5  ;;  %v348_v11 = vunpack.c.3.s8 %v335_v5  ;;  %v345_v17 = vunpack.c.0.s8 %v335_v5  ;;  %v346_v18 = vunpack.c.1.s8 %v335_v5  ;;  %v329_v49 = vld [vmem:[%s776_s13 + $0x8] sm:$0xff]  ;;  %v330_v50 = vld [vmem:[%s776_s13 + $0x10] sm:$0xff] }
  0x29   : > { %v367_v12 = vcvt.s32.f32 %v351_v6  ;;  %v368_v13 = vcvt.s32.f32 %v352_v7  ;;  %v365_v14 = vcvt.s32.f32 %v349_v8  ;;  %v366_v15 = vcvt.s32.f32 %v350_v9 }
  0x2a   : > { %v363_v20 = vcvt.s32.f32 %v347_v10  ;;  %v364_v21 = vcvt.s32.f32 %v348_v11  ;;  %v361_v23 = vcvt.s32.f32 %v345_v17  ;;  %v362_v24 = vcvt.s32.f32 %v346_v18  ;;  %v377_v53 = vld [vmem:[#allocation2 + $0x10] sm:$0xff] }
  0x2b   : > { %v376_v16 = vpack.c.bf16 %v368_v13, %v367_v12  ;;  %v375_v19 = vpack.c.bf16 %v366_v15, %v365_v14  ;;  %v343_v26 = vunpack.c.2.s8 %v334_v22  ;;  %v344_v27 = vunpack.c.3.s8 %v334_v22  ;;  %v378_v59 = vld [vmem:[#allocation2] sm:$0xff] }
  0x2c   : > { %v374_v25 = vpack.c.bf16 %v364_v21, %v363_v20  ;;  %v373_v28 = vpack.c.bf16 %v362_v24, %v361_v23  ;;  %v341_v31 = vunpack.c.0.s8 %v334_v22  ;;  %v342_v32 = vunpack.c.1.s8 %v334_v22  ;;  %v379_v54 = vld [vmem:[#allocation2 + $0x8] sm:$0xff] }
  0x2d   : > { %380 = vmatpush.bf16.msra.mxu0 %v376_v16  ;;  %560 = vmatpush.bf16.msra.mxu1 %v376_v16  ;;  %v359_v29 = vcvt.s32.f32 %v343_v26  ;;  %v360_v30 = vcvt.s32.f32 %v344_v27  ;;  %v339_v34 = vunpack.c.2.s8 %v333_v33  ;;  %v340_v38 = vunpack.c.3.s8 %v333_v33 }
  0x2e   : > { %v357_v36 = vcvt.s32.f32 %v341_v31  ;;  %v358_v37 = vcvt.s32.f32 %v342_v32  ;;  %v337_v39 = vunpack.c.0.s8 %v333_v33  ;;  %v338_v43 = vunpack.c.1.s8 %v333_v33 }
  0x2f   : > { %v372_v35 = vpack.c.bf16 %v360_v30, %v359_v29  ;;  %v355_v41 = vcvt.s32.f32 %v339_v34  ;;  %v356_v42 = vcvt.s32.f32 %v340_v38  ;;  %v331_v51 = vpack.c.bf16 %v329_v49, %v328_v48 }
  0x30   : > { %v371_v40 = vpack.c.bf16 %v358_v37, %v357_v36  ;;  %v353_v45 = vcvt.s32.f32 %v337_v39  ;;  %v354_v46 = vcvt.s32.f32 %v338_v43  ;;  %v332_v52 = vpack.c.bf16 %v330_v50, %v330_v50 }
  0x31   : > { %381 = vmatpush.bf16.msra.mxu0 %v375_v19  ;;  %561 = vmatpush.bf16.msra.mxu1 %v375_v19  ;;  %v370_v44 = vpack.c.bf16 %v356_v42, %v355_v41 }
  0x32   : > { %v369_v47 = vpack.c.bf16 %v354_v46, %v353_v45 }
  0x35   : > { %382 = vmatpush.bf16.msra.mxu0 %v374_v25  ;;  %562 = vmatpush.bf16.msra.mxu1 %v374_v25 }
  0x39   : > { %383 = vmatpush.bf16.msra.mxu0 %v373_v28  ;;  %563 = vmatpush.bf16.msra.mxu1 %v373_v28 }
  0x3d   : > { %384 = vmatpush.bf16.msra.mxu0 %v372_v35  ;;  %564 = vmatpush.bf16.msra.mxu1 %v372_v35 }
  0x41   : > { %385 = vmatpush.bf16.msra.mxu0 %v371_v40  ;;  %565 = vmatpush.bf16.msra.mxu1 %v371_v40 }
  0x45   : > { %386 = vmatpush.bf16.msra.mxu0 %v370_v44  ;;  %566 = vmatpush.bf16.msra.mxu1 %v370_v44 }
  0x49   : > { %387 = vmatpush.bf16.msra.mxu0 %v369_v47  ;;  %567 = vmatpush.bf16.msra.mxu1 %v369_v47 }
  0x4c   : > { %388 = vmatmul.bf16.vlgmr.msra.gmra.mxu0 %v331_v51  ;;  %393 = vmatmul.bf16.vlgmr.msra.gmra.mxu1 %v332_v52 }
  0xc9   : > { %v389_v55 = vpop.f32.mrf.mxu0  ;;  %v394_v56 = vpop.f32.mrf.mxu1 }
  0xca   : > { %v398_v57 = vadd.f32 %v389_v55, %v377_v53  ;;  %v400_v58 = vadd.f32 %v394_v56, %v379_v54 }
  0xcc   : > { %401 = vst [vmem:[#allocation2 + $0x10] sm:$0xff] %v398_v57 }
  0xcd   : > { %403 = vst [vmem:[#allocation2 + $0x8] sm:$0xff] %v400_v58 }
  0xd0   : > { %407 = sbr.rel (%p555_p11) target bundleno = 225 (0xe1), region = 82 }
  0xd1   : > { %v391_v60 = vpop.f32.mrf.mxu0  ;;  %v396_v61 = vpop.f32.mrf.mxu1 }
  0xd2   : > { %v399_v62 = vadd.f32 %v391_v60, %v378_v59 }
  0xd4   : > { %402 = vst [vmem:[#allocation2] sm:$0xff] %v399_v62 }
  0xd5   : > { %v408_v63 = vld [vmem:[#allocation2 + $0x10] sm:$0xff]  ;;  %v620_v0 = vld [vmem:[%s815_s2] ss:$0 sm:$0xff]  ;;  %v410_v5 = vld [vmem:[#allocation2 + $0x8] sm:$0xff] }
  0xd6   : > { %v621_v1 = vld [vmem:[%s816_s3] ss:$0 sm:$0xff]  ;;  %v415_v3 = vmul.f32 %v620_v0, %v408_v63  ;;  %v417_v6 = vmul.f32 %v620_v0, %v410_v5 }
  0xd8   : > { %v422_v7 = vadd.f32 %v621_v1, %v415_v3  ;;  %v424_v9 = vadd.f32 %v621_v1, %v417_v6 }
  0xda   : > { %425 = vst [vmem:[#allocation4] sm:$0xff] %v422_v7 }
  0xdb   : > { %v409_v2 = vld [vmem:[#allocation2] sm:$0xff]  ;;  %427 = vst [vmem:[#allocation4 + $0x10] sm:$0xff] %v424_v9 }
  0xdc   : > { %v416_v4 = vmul.f32 %v620_v0, %v409_v2 }
  0xde   : > { %v423_v8 = vadd.f32 %v621_v1, %v416_v4 }
  0xe0   : > { %426 = vst [vmem:[#allocation4 + $0x8] sm:$0xff] %v423_v8 }
  0xe1 PF: > { %p574_p12 = scmp.eq.s32.totalorder %s545_s20, 1  ;;  %s439_s26 = sshll.u32 %s817_s4, 4  ;;  %s440_s26 = int_to_ptr.hbm [resolvable:$true] %s439_s26 }
  0xe2   : > { %s695_s27 = smov [#allocation4]   ;;  %s696_s29 = smov 128  }
  0xe3   : > { %s437_s28 = sshll.u32 %s695_s27, 4  ;;  %s697_s30 = smov 8   ;;  %s438_s28 = int_to_ptr.vmem [resolvable:$true] %s437_s28 }
  0xe4   : > { %571 = dma.vmem_to_hbm [thread:$0]  (%p574_p12), %s438_s28, 384, %s440_s26, [#allocation5], %s696_s29, %s696_s29, %s697_s30  }
  0xe5   : > { %671 = dma.done.wait (%p574_p12), [#allocation5], 384  }
  0xe6   : > { %673 = vsyncadd (%p574_p12), [#allocation5], 4294966912 }
  0xe7 PF: > { %s15_s19 = sadd.s32 1, %s692_s19   ;;  %s818_s15 = smov %s680_s16 }
  0xe8   : > { %p12_p13 = scmp.ge.s32.totalorder %s15_s19, 4   ;;  %s819_s16 = smov %s759_s24 }
  0xe9   : > { %s820_s17 = smov %s688_s18  ;;  %s821_s18 = smov %s823_s21 }
  0xea   :  { %14 = sbr.rel (!%p12_p13) target bundleno = 3 (0x3), region = 124 }
  0xef   :  { %456 = vsyncpa [#allocation5], 1 }
  0xf0   :  { %458 = vsyncpa [#allocation5 + $0x1], 1 }

</bundles_post_ra>
